<compile_context>
chip_gen: v6e
topology: v6e:2x2x1
jax: 0.10.0
libtpu: 0.0.40
codegen_flags: <defaults>
</compile_context>

<pallas_src>
import jax
import jax.numpy as jnp
from jax import lax
from jax.experimental import pallas as pl
from jax.experimental.pallas import tpu as pltpu


def pgcl_kernel(x_ref, loss_ref):
    x = x_ref[...]                                        # (4, N, D) float32
    n = x.shape[1]

    # torch F.normalize(p=2, dim=-1): x / max(||x||, 1e-12)
    #   == x * rsqrt(max(||x||^2, 1e-24))   (single rsqrt, no sqrt + divide)
    ss = jnp.sum(x * x, axis=-1, keepdims=True)           # (4, N, 1)
    r = lax.rsqrt(jnp.maximum(ss, 1e-24))
    xn = x * r                                            # (4, N, D)
    # -0.5 * ||xn||^2  (== -0.5 unless ||x|| < 1e-12); ss*r^2 keeps torch's
    # eps-clamp behaviour without a second lane reduce.
    neg_half_sq = -0.5 * (ss * (r * r))                   # (4, N, 1)
    ones = jnp.ones_like(neg_half_sq)

    # Augmented operands: u_i . v_j = xn_i.xn_j - 0.5*sq_i - 0.5*sq_j
    #                               = G_m[i, j] - 1
    u = jnp.concatenate([xn, neg_half_sq, ones], axis=-1)   # (4, N, D+2)
    v = jnp.concatenate([xn, ones, neg_half_sq], axis=-1)   # (4, N, D+2)

    # Batched per-modality Gram: g[m] == G_m - 1, each block lane-0 aligned.
    g = jnp.einsum("mik,mjk->mij", u, v,
                   preferred_element_type=jnp.float32)      # (4, N, N)

    # (G_t - G_s) == g[0] - g[s]; the "1 -" offsets cancel exactly.
    d = g[0] - g[1:4]                                        # (3, N, N)

    inv_temp = 1.0 / 0.1
    scale = (inv_temp * inv_temp) / float(n * n)
    loss_ref[0, 0] = jnp.sum(d * d) * scale


def pgcl_loss(fm_rgb, fm_depth, fm_ir, fm_t):
    """PGCL loss for [N, D] feature matrices (one per modality, same shape)."""
    # Stack once in XLA: the kernel sees a single (4, N, D) input (one DMA).
    x = jnp.stack([fm_t, fm_rgb, fm_depth, fm_ir], axis=0)
    if x.dtype != jnp.float32:
        x = x.astype(jnp.float32)
    _, n, d = x.shape

    # Rough padded VMEM footprint (x + xn + u + v + g + diffs); only raise the
    # scoped limit when the smallest default (16 MiB on v5e) is not enough.
    def rup(v, m):
        return -(-v // m) * m

    f32 = 4
    est = f32 * (
        2 * 4 * rup(n, 8) * rup(d, 128)          # x, xn
        + 2 * 4 * rup(n, 8) * rup(d + 2, 128)    # u, v
        + 8 * rup(n, 8) * rup(n, 128)            # g (4) + d (3) + slack
    ) * 2                                        # headroom for compiler temps
    compiler_params = None
    if est > (16 << 20):
        # TODO(synk): past N ~ 1024 (v7x: ~512) switch to an (i, j)-tiled grid
        # with a pl.when-initialized scalar accumulator instead of just
        # raising the limit (v7x only has 64 MiB physical VMEM).
        compiler_params = pltpu.CompilerParams(
            vmem_limit_bytes=min(est, 100 << 20))

    out = pl.pallas_call(
        pgcl_kernel,
        out_shape=jax.ShapeDtypeStruct((1, 1), jnp.float32),
        in_specs=[pl.BlockSpec(memory_space=pltpu.MemorySpace.VMEM)],
        out_specs=pl.BlockSpec(memory_space=pltpu.MemorySpace.SMEM),
        compiler_params=compiler_params,
    )(x)
    return out[0, 0]


if __name__ == "__main__":
    key = jax.random.PRNGKey(0)
    k1, k2, k3, k4 = jax.random.split(key, 4)

    N, D = 8, 32  # small shapes: 8 samples, 32-dim features
    fm_rgb = jax.random.normal(k1, (N, D), dtype=jnp.float32)
    fm_depth = jax.random.normal(k2, (N, D), dtype=jnp.float32)
    fm_ir = jax.random.normal(k3, (N, D), dtype=jnp.float32)
    fm_t = jax.random.normal(k4, (N, D), dtype=jnp.float32)

    loss = pgcl_loss(fm_rgb, fm_depth, fm_ir, fm_t)
    jax.block_until_ready(loss)

    # Pure-JAX reference check (same math as the PyTorch forward).
    def _ref_gram(x):
        xn = x / jnp.maximum(jnp.linalg.norm(x, axis=-1, keepdims=True), 1e-12)
        diff = xn[:, None, :] - xn[None, :, :]
        return 1.0 - 0.5 * jnp.sum(diff * diff, axis=-1)

    g_t = _ref_gram(fm_t)
    ref = (
        jnp.mean((g_t / 0.1 - _ref_gram(fm_rgb) / 0.1) ** 2)
        + jnp.mean((g_t / 0.1 - _ref_gram(fm_depth) / 0.1) ** 2)
        + jnp.mean((g_t / 0.1 - _ref_gram(fm_ir) / 0.1) ** 2)
    )
    assert jnp.allclose(loss, ref, rtol=1e-4, atol=1e-4), (loss, ref)

    print("KERNEL_OK")
</pallas_src>

<mosaic_0001>
module attributes {stable_mosaic.version = 11 : i64} {
  func.func @pgcl_kernel(%arg0: memref<4x8x32xf32, #tpu.memory_space<vmem>>, %arg1: memref<1x1xf32, #tpu.memory_space<smem>>) attributes {dimension_semantics = [], scalar_prefetch = 0 : i64, scratch_operands = 0 : i64, tpu.core_type = #tpu.core_type<tc>} {
    %c0 = arith.constant 0 : index
    %c0_0 = arith.constant 0 : index
    %c0_1 = arith.constant 0 : index
    %0 = vector.load %arg0[%c0, %c0_0, %c0_1] : memref<4x8x32xf32, #tpu.memory_space<vmem>>, vector<4x8x32xf32>
    %1 = arith.mulf %0, %0 : vector<4x8x32xf32>
    %cst = arith.constant dense<0.000000e+00> : vector<4x8xf32>
    %2 = vector.multi_reduction <add>, %1, %cst [2] : vector<4x8x32xf32> to vector<4x8xf32>
    %3 = vector.shape_cast %2 : vector<4x8xf32> to vector<4x8x1xf32>
    %cst_2 = arith.constant 1.000000e-24 : f32
    %4 = vector.broadcast %cst_2 : f32 to vector<4x8x1xf32>
    %5 = arith.maximumf %3, %4 : vector<4x8x1xf32>
    %6 = math.rsqrt %5 : vector<4x8x1xf32>
    %7 = vector.broadcast %6 : vector<4x8x1xf32> to vector<4x8x32xf32>
    %8 = arith.mulf %0, %7 : vector<4x8x32xf32>
    %9 = arith.mulf %6, %6 : vector<4x8x1xf32>
    %10 = arith.mulf %3, %9 : vector<4x8x1xf32>
    %cst_3 = arith.constant -5.000000e-01 : f32
    %11 = vector.broadcast %cst_3 : f32 to vector<4x8x1xf32>
    %12 = arith.mulf %11, %10 : vector<4x8x1xf32>
    %cst_4 = arith.constant 1.000000e+00 : f32
    %13 = vector.broadcast %cst_4 : f32 to vector<4x8x1xf32>
    %14 = tpu.concatenate %8, %12, %13 in 2 : vector<4x8x32xf32>, vector<4x8x1xf32>, vector<4x8x1xf32> -> vector<4x8x34xf32>
    %15 = tpu.concatenate %8, %13, %12 in 2 : vector<4x8x32xf32>, vector<4x8x1xf32>, vector<4x8x1xf32> -> vector<4x8x34xf32>
    "tpu.trace_start"() <{level = 10 : i32, message = "mik,mjk->mij"}> : () -> ()
    %cst_5 = arith.constant dense<0.000000e+00> : vector<4x8x8xf32>
    %16 = tpu.matmul %14, %15, %cst_5 {dimension_numbers = #tpu.dot_dimension_numbers<[2], [2], [1], [1], [0, 0, 0, 1, 1, 1], [0], [0]>} : vector<4x8x34xf32>, vector<4x8x34xf32>, vector<4x8x8xf32> -> vector<4x8x8xf32>
    "tpu.trace_stop"() : () -> ()
    %17 = vector.extract_strided_slice %16 {offsets = [0, 0, 0], sizes = [1, 8, 8], strides = [1, 1, 1]} : vector<4x8x8xf32> to vector<1x8x8xf32>
    %18 = vector.shape_cast %17 : vector<1x8x8xf32> to vector<8x8xf32>
    %19 = vector.extract_strided_slice %16 {offsets = [1, 0, 0], sizes = [3, 8, 8], strides = [1, 1, 1]} : vector<4x8x8xf32> to vector<3x8x8xf32>
    %20 = vector.shape_cast %18 : vector<8x8xf32> to vector<1x8x8xf32>
    %21 = vector.broadcast %20 : vector<1x8x8xf32> to vector<3x8x8xf32>
    %22 = arith.subf %21, %19 : vector<3x8x8xf32>
    %23 = arith.mulf %22, %22 : vector<3x8x8xf32>
    %24 = vector.shape_cast %23 : vector<3x8x8xf32> to vector<1x3x8x8xf32>
    %cst_6 = arith.constant dense<0.000000e+00> : vector<1xf32>
    %25 = vector.multi_reduction <add>, %24, %cst_6 [1, 2, 3] : vector<1x3x8x8xf32> to vector<1xf32>
    %26 = vector.shape_cast %25 : vector<1xf32> to vector<1x1x1x1xf32>
    %27 = vector.extract %26[0, 0, 0, 0] : f32 from vector<1x1x1x1xf32>
    %cst_7 = arith.constant 1.562500e+00 : f32
    %28 = arith.mulf %27, %cst_7 : f32
    %c0_8 = arith.constant 0 : index
    %c0_9 = arith.constant 0 : index
    %29 = memref.load %arg1[%c0_8, %c0_9] : memref<1x1xf32, #tpu.memory_space<smem>>
    memref.store %28, %arg1[%c0_8, %c0_9] : memref<1x1xf32, #tpu.memory_space<smem>>
    return
  }
}

</mosaic_0001>

<bundles_post_ra>
// kernel: tpu_custom_call.1
= control target key start
LH: loop header
LB: loop body
LE: loop exit
PB: predicated region body
PF: predicated region fallthrough
CT: control target
= control target key end

     0   :  { %6 = vsyncpa [#allocation3], 0  ;;  %s574_s0 = inlined_call_operand.hbm [shape: f32[4,8,32], index: 0, kind: input, shape index: {}]   ;;  %s575_s1 = inlined_call_operand.hbm [shape: f32[1,1], index: 1, kind: output, shape index: {}]  }
   0x1   :  { %7 = vsyncpa [#allocation4], 0  ;;  %s512_s6 = smov [#allocation2]  }
   0x2   :  { %s13_s7 = sshll.u32 %s512_s6, 4  ;;  %s14_s7 = int_to_ptr.vmem [resolvable:$true] %s13_s7 }
   0x3   :  { %s488_s8 = scalar_lea.vmem %s14_s7, 512  ;;  %p493_p1 = scmp.lt.s32.totalorder %s14_s7, %s14_s7 }
   0x4   :  { %p489_p0 = scmp.ne.s32.totalorder %s14_s7, %s488_s8  ;;  %p494_p2 = scmp.lt.s32.totalorder %s488_s8, %s488_s8 }
   0x6   :  { %p495_p3 = por %p494_p2, %p493_p1 }
   0x8   :  { %p496_p4 = pnand %p495_p3, %p489_p0 }
   0xa   :  { %499 = shalt.err (!%p496_p4)
}
   0xb   :  { %s513_s9 = smov 128   ;;  %s514_s10 = smov 8  }
   0xc   :  { %19 = dma.hbm_to_vmem [thread:$0]  %s574_s0, 512, %s14_s7, [#allocation3], %s513_s9, %s513_s9, %s514_s10  }
   0xd   :  { %508 = dma.done.wait [#allocation3], 512  }
   0xe   :  { %509 = vsyncadd [#allocation3], 4294966784  ;;  %v25_v0 = vld [vmem:[#allocation2 + $0x10] sm:$0xff]  ;;  %vm31_vm0 = vcmask 261120   ;;  %v23_v1 = vld [vmem:[#allocation2] sm:$0xff]  ;;  %v515_v12 = vmov 0.0  }
   0xf   :  { %v26_v2 = vld [vmem:[#allocation2 + $0x18] sm:$0xff]  ;;  %v29_v3 = vmul.f32 %v25_v0, %v25_v0  ;;  %v27_v4 = vmul.f32 %v23_v1, %v23_v1  ;;  %v24_v6 = vld [vmem:[#allocation2 + $0x8] sm:$0xff]  ;;  %444 = vmatprep.subr.mxu0 %v515_v12  ;;  %449 = vmatprep.subr.mxu1 %v515_v12  ;;  %vm516_vm1 = vmmov 0   ;;  %vm72_vm2 = vcmask 269312   ;;  %s517_s14 = smov [#allocation5]  }
  0x10   :  { %v30_v5 = vmul.f32 %v26_v2, %v26_v2  ;;  %v28_v7 = vmul.f32 %v24_v6, %v24_v6  ;;  %446 = vmatprep.mubr.msk.f32.mxu0 %vm516_vm1, %v515_v12  ;;  %451 = vmatprep.mubr.msk.f32.mxu1 %vm516_vm1, %v515_v12  ;;  %vm85_vm3 = vcmask 277504   ;;  %vm396_vm4 = vcmask 64512  }
  0x11   :  { %v38_v8 = vsel %vm31_vm0, %v29_v3, 0.0  ;;  %v32_v9 = vsel %vm31_vm0, %v27_v4, 0.0 }
  0x12   :  { %39 = vadd.xlane.f32.xlu1 %v38_v8  ;;  %33 = vadd.xlane.f32.xlu0 %v32_v9  ;;  %v41_v10 = vsel %vm31_vm0, %v30_v5, 0.0  ;;  %v35_v11 = vsel %vm31_vm0, %v28_v7, 0.0 }
  0x16   :  { %42 = vadd.xlane.f32.xlu1 %v41_v10  ;;  %36 = vadd.xlane.f32.xlu0 %v35_v11 }
  0x9b   :  { %v40_v13 = vpop.xlane.xlu1 %39  ;;  %v34_v14 = vpop.xlane.xlu0 %33 }
  0x9c   :  { %v46_v15 = vmax.f32 %v40_v13, 1e-24  ;;  %v44_v16 = vmax.f32 %v34_v14, 1e-24 }
  0x9e   :  { %472 = vrsqrt.f32 %v46_v15 }
  0x9f   :  { %474 = vrsqrt.f32 %v44_v16  ;;  %v43_v17 = vpop.xlane.xlu1 %42  ;;  %v37_v18 = vpop.xlane.xlu0 %36 }
  0xa0   :  { %v47_v19 = vmax.f32 %v43_v17, 1e-24  ;;  %v45_v20 = vmax.f32 %v37_v18, 1e-24 }
  0xa2   :  { %476 = vrsqrt.f32 %v47_v19 }
  0xa3   :  { %478 = vrsqrt.f32 %v45_v20 }
  0xab   :  { %v473_v21 = vpop.eup %472 }
  0xac   :  { %v475_v22 = vpop.eup %474  ;;  %v58_v23 = vmul.f32 %v473_v21, %v473_v21  ;;  %v54_v27 = vmul.f32 %v473_v21, %v25_v0 }
  0xad   :  { %v56_v24 = vmul.f32 %v475_v22, %v475_v22  ;;  %v52_v26 = vmul.f32 %v475_v22, %v23_v1 }
  0xae   :  { %v62_v25 = vmul.f32 %v58_v23, %v40_v13  ;;  %v79_v37 = vsel %vm31_vm0, %v54_v27, 1.0 }
  0xaf   :  { %v477_v28 = vpop.eup %476  ;;  %v60_v29 = vmul.f32 %v56_v24, %v34_v14  ;;  %v77_v35 = vsel %vm31_vm0, %v52_v26, 1.0 }
  0xb0   :  { %v479_v30 = vpop.eup %478  ;;  %v59_v31 = vmul.f32 %v477_v28, %v477_v28  ;;  %v66_v34 = vmul.f32 -0.5, %v62_v25  ;;  %v55_v42 = vmul.f32 %v477_v28, %v26_v2 }
  0xb1   :  { %v64_v32 = vmul.f32 -0.5, %v60_v29  ;;  %v57_v33 = vmul.f32 %v479_v30, %v479_v30  ;;  %v53_v36 = vmul.f32 %v479_v30, %v24_v6 }
  0xb2   :  { %v63_v38 = vmul.f32 %v59_v31, %v43_v17  ;;  %v83_v46 = vsel %vm72_vm2, %v79_v37, %v66_v34  ;;  %v70_v50 = vsel %vm31_vm0, %v54_v27, %v66_v34  ;;  %v80_v51 = vsel %vm31_vm0, %v55_v42, 1.0 }
  0xb3   :  { %v61_v39 = vmul.f32 %v57_v33, %v37_v18  ;;  %v81_v40 = vsel %vm72_vm2, %v77_v35, %v64_v32  ;;  %v68_v41 = vsel %vm31_vm0, %v52_v26, %v64_v32  ;;  %v78_v45 = vsel %vm31_vm0, %v53_v36, 1.0 }
  0xb4   :  { %445 = vmatpush3.xpose.msk.msra.mxu0 %vm85_vm3, %v81_v40  ;;  %v73_v44 = vsel %vm72_vm2, %v68_v41, 1.0  ;;  %v67_v47 = vmul.f32 -0.5, %v63_v38  ;;  %v75_v53 = vsel %vm72_vm2, %v70_v50, 1.0 }
  0xb5   :  { %v65_v43 = vmul.f32 -0.5, %v61_v39  ;;  %454 = vmatprep.subr.mxu0 %v515_v12 }
  0xb6   :  { %v71_v54 = vsel %vm31_vm0, %v55_v42, %v67_v47  ;;  %v84_v55 = vsel %vm72_vm2, %v80_v51, %v67_v47 }
  0xb7   :  { %447 = vmatmul.mubr.msk.f32.vlgmr.msra.gmra.mxu0 %vm85_vm3, %v73_v44  ;;  %v82_v48 = vsel %vm72_vm2, %v78_v45, %v65_v43  ;;  %v69_v49 = vsel %vm31_vm0, %v53_v36, %v65_v43  ;;  %v76_v56 = vsel %vm72_vm2, %v71_v54, 1.0 }
  0xb8   :  { %450 = vmatpush3.xpose.msk.msra.mxu1 %vm85_vm3, %v82_v48  ;;  %455 = vmatpush3.xpose.msk.msra.mxu0 %vm85_vm3, %v83_v46  ;;  %v74_v52 = vsel %vm72_vm2, %v69_v49, 1.0 }
  0xb9   :  { %456 = vmatprep.mubr.msk.f32.mxu0 %vm516_vm1, %v515_v12  ;;  %459 = vmatprep.subr.mxu1 %v515_v12 }
  0xbb   :  { %452 = vmatmul.mubr.msk.f32.vlgmr.msra.gmra.mxu1 %vm85_vm3, %v74_v52  ;;  %457 = vmatmul.mubr.msk.f32.vlgmr.msra.gmra.mxu0 %vm85_vm3, %v75_v53 }
  0xbc   :  { %460 = vmatpush3.xpose.msk.msra.mxu1 %vm85_vm3, %v84_v55  ;;  %461 = vmatprep.mubr.msk.f32.mxu1 %vm516_vm1, %v515_v12 }
  0xbf   :  { %462 = vmatmul.mubr.msk.f32.vlgmr.msra.gmra.mxu1 %vm85_vm3, %v76_v56 }
 0x177   :  { %v158_v57 = vpop.f32.mrf.mxu0 }
 0x179   :  { %v448_v58 = vpop.f32.mrf.mxu0 }
 0x17b   :  { %v234_v59 = vpop.f32.mrf.mxu1  ;;  %v310_v60 = vpop.f32.mrf.mxu0 }
 0x17c   :  { %v390_v61 = vsub.f32 %v158_v57, %v234_v59  ;;  %v391_v62 = vsub.f32 %v158_v57, %v310_v60 }
 0x17d   :  { %v453_v63 = vpop.f32.mrf.mxu1  ;;  %v458_v0 = vpop.f32.mrf.mxu0 }
 0x17e   :  { %v393_v1 = vmul.f32 %v390_v61, %v390_v61  ;;  %v394_v2 = vmul.f32 %v391_v62, %v391_v62 }
 0x17f   :  { %v386_v3 = vpop.f32.mrf.mxu1 }
 0x180   :  { %v397_v4 = vsel %vm396_vm4, %v393_v1, 0.0  ;;  %v398_v5 = vsel %vm396_vm4, %v394_v2, 0.0  ;;  %v392_v6 = vsub.f32 %v158_v57, %v386_v3 }
 0x181   :  { %v463_v7 = vpop.f32.mrf.mxu1  ;;  %v399_v9 = vadd.f32 %v398_v5, %v397_v4 }
 0x182   :  { %v395_v8 = vmul.f32 %v392_v6, %v392_v6 }
 0x184   :  { %v400_v10 = vsel %vm396_vm4, %v395_v8, 0.0 }
 0x185   :  { %v401_v11 = vadd.f32 %v400_v10, %v399_v9 }
 0x187   :  { %402 = vadd.xlane.f32.xlu0 %v401_v11 }
 0x210   :  { %v403_v12 = vpop.xlane.xlu0 %402 }
 0x211   :  { %v404_v13 = vrot.slane %v403_v12, 4 }
 0x213   :  { %v405_v14 = vadd.f32 %v404_v13, %v403_v12 }
 0x215   :  { %v406_v15 = vrot.slane %v405_v14, 2 }
 0x217   :  { %v407_v16 = vadd.f32 %v406_v15, %v405_v14 }
 0x219   :  { %v408_v17 = vrot.slane %v407_v16, 1 }
 0x21b   :  { %v409_v18 = vadd.f32 %v408_v17, %v407_v16 }
 0x21d   :  { %464 = vpush %v409_v18 }
 0x24e   :  { %s465_s0 = spop %464 }
 0x24f   :  { %s411_s13 = smul.f32 1.5625, %s465_s0 }
 0x251   :  { %413 = sst [smem:[#allocation5]] %s411_s13 }
 0x252   :  { %421 = dma.smem_to_hbm %s517_s14, 16, %s575_s1, [#allocation4]  }
 0x253   :  { %510 = dma.done.wait [#allocation4], 16  }
 0x254   :  { %511 = vsyncadd [#allocation4], 4294967280 }
 0x255   :  { %425 = sfence }
 0x256   :  { %426 = vsyncpa [#allocation3], 1 }
 0x257   :  { %427 = vsyncpa [#allocation4], 1 }

</bundles_post_ra>
